<compile_context>
chip_gen: v5e
topology: v5e:2x2
jax: 0.10.0
libtpu: 0.0.40
codegen_flags: <defaults>
</compile_context>

<pallas_src>
import functools

import jax
import jax.numpy as jnp
from jax.experimental import pallas as pl
from jax.experimental.pallas import tpu as pltpu


# ---------------------------------------------------------------------------
# helpers
# ---------------------------------------------------------------------------
def _round_up(x, m):
    return ((x + m - 1) // m) * m


def _pad2(x, rows, cols):
    pr = rows - x.shape[0]
    pc = cols - x.shape[1]
    if pr == 0 and pc == 0:
        return x
    return jnp.pad(x, ((0, pr), (0, pc)))


# ---------------------------------------------------------------------------
# stage 1: no-bias linear projection  y = x @ W.T  (W stored PyTorch-style (out, in))
# ---------------------------------------------------------------------------
def _linear_kernel(x_ref, w_ref, o_ref, *, scale, compute_dtype):
    x = x_ref[...].astype(compute_dtype)
    w = w_ref[...].astype(compute_dtype)
    # contract over the last dim of both operands -> x @ W.T, no explicit transpose
    y = jax.lax.dot_general(
        x, w, (((1,), (1,)), ((), ())), preferred_element_type=jnp.float32
    )
    if scale != 1.0:
        y = y * jnp.float32(scale)  # fold 1/sqrt(d_model) into q (S*D, not S*S)
    o_ref[...] = y.astype(o_ref.dtype)


def _project(x_p, w_p, *, scale, row_tile, out_dtype, compute_dtype):
    s_pad, d_in = x_p.shape
    d_out = w_p.shape[0]
    grid = (s_pad // row_tile,)
    return pl.pallas_call(
        functools.partial(_linear_kernel, scale=scale, compute_dtype=compute_dtype),
        out_shape=jax.ShapeDtypeStruct((s_pad, d_out), out_dtype),
        grid_spec=pltpu.PrefetchScalarGridSpec(
            num_scalar_prefetch=0,
            grid=grid,
            in_specs=[
                pl.BlockSpec((row_tile, d_in), lambda i: (i, 0)),
                pl.BlockSpec((d_out, d_in), lambda i: (0, 0)),  # weight stays resident
            ],
            out_specs=pl.BlockSpec((row_tile, d_out), lambda i: (i, 0)),
        ),
        compiler_params=pltpu.CompilerParams(dimension_semantics=("parallel",)),
    )(x_p, w_p)


# ---------------------------------------------------------------------------
# stage 2: flash-style attention with online softmax
# ---------------------------------------------------------------------------
def _flash_kernel(*args, has_mask, kpad, sk_valid, tkv):
    if has_mask:
        q_ref, k_ref, v_ref, mask_ref, o_ref, m_sc, l_sc, acc_sc = args
    else:
        q_ref, k_ref, v_ref, o_ref, m_sc, l_sc, acc_sc = args
        mask_ref = None

    kv = pl.program_id(1)

    @pl.when(kv == 0)
    def _():
        m_sc[...] = jnp.full_like(m_sc, -jnp.inf)
        l_sc[...] = jnp.zeros_like(l_sc)
        acc_sc[...] = jnp.zeros_like(acc_sc)

    q = q_ref[...]
    k = k_ref[...]
    # scores = q @ k.T (scale already folded into q); contraction over last dims.
    s = jax.lax.dot_general(
        q, k, (((1,), (1,)), ((), ())), preferred_element_type=jnp.float32
    )

    if has_mask:
        s = jnp.where(mask_ref[...] != 0, jnp.float32(-1e9), s)

    if kpad:
        # in-kernel key-padding mask (padded key columns) — no HBM traffic.
        col = kv * tkv + jax.lax.broadcasted_iota(jnp.int32, s.shape, 1)
        pad = col >= sk_valid
        s = jnp.where(pad, jnp.float32(-1e9), s)

    # online softmax (all math in f32; v5e has no bf16 VPU/EUP)
    m_prev = m_sc[...]
    m_new = jnp.maximum(m_prev, jnp.max(s, axis=1, keepdims=True))
    alpha = jnp.exp(m_prev - m_new)
    p = jnp.exp(s - m_new)
    if kpad:
        p = jnp.where(pad, jnp.float32(0.0), p)  # padded keys contribute nothing

    l_sc[...] = alpha * l_sc[...] + jnp.sum(p, axis=1, keepdims=True)
    acc_sc[...] = alpha * acc_sc[...] + jnp.dot(
        p.astype(v_ref.dtype), v_ref[...], preferred_element_type=jnp.float32
    )
    m_sc[...] = m_new

    @pl.when(kv == pl.num_programs(1) - 1)
    def _():
        inv_l = pl.reciprocal(l_sc[...], approx=True)  # EUP vrcp — ~free
        o_ref[...] = (acc_sc[...] * inv_l).astype(o_ref.dtype)


# ---------------------------------------------------------------------------
# public wrapper matching Attention.forward semantics
# ---------------------------------------------------------------------------
def attention(enc_q, enc_k, enc_v, w_q, w_k, w_v, mask=None, use_bf16=True):
    Sq, D = enc_q.shape
    Sk = enc_k.shape[0]

    # ---- padded / lane-dense geometry --------------------------------------
    d_pad = max(128, _round_up(D, 128))

    if Sq > 128:
        tq = 128
        sq_pad = _round_up(Sq, tq)
    else:
        sq_pad = _round_up(Sq, 8)
        tq = sq_pad

    sk_pad = _round_up(Sk, 128)            # lane-dense score columns
    tkv = 256 if (sk_pad % 256 == 0) else 128
    # TODO(synk): halve the kv tile (and raise vmem_limit_bytes) on v7x for very
    # long sequences — 64 MiB VMEM vs 128 MiB on v5e/v6e.

    compute_dtype = jnp.bfloat16 if use_bf16 else jnp.float32
    qkv_dtype = jnp.bfloat16 if use_bf16 else jnp.float32
    f32 = jnp.float32

    xq = _pad2(enc_q.astype(f32), sq_pad, d_pad)
    xk = _pad2(enc_k.astype(f32), sk_pad, d_pad)
    xv = _pad2(enc_v.astype(f32), sk_pad, d_pad)
    wq = _pad2(w_q.astype(f32), d_pad, d_pad)
    wk = _pad2(w_k.astype(f32), d_pad, d_pad)
    wv = _pad2(w_v.astype(f32), d_pad, d_pad)

    scale = 1.0 / float(D) ** 0.5          # k.size(col_dim) == d_model (unpadded)

    q_p = _project(xq, wq, scale=scale, row_tile=tq,
                   out_dtype=qkv_dtype, compute_dtype=compute_dtype)
    k_p = _project(xk, wk, scale=1.0, row_tile=tkv,
                   out_dtype=qkv_dtype, compute_dtype=compute_dtype)
    v_p = _project(xv, wv, scale=1.0, row_tile=tkv,
                   out_dtype=qkv_dtype, compute_dtype=compute_dtype)

    has_mask = mask is not None
    kpad = sk_pad != Sk

    operands = [q_p, k_p, v_p]
    in_specs = [
        pl.BlockSpec((tq, d_pad), lambda i, j: (i, 0)),
        pl.BlockSpec((tkv, d_pad), lambda i, j: (j, 0)),
        pl.BlockSpec((tkv, d_pad), lambda i, j: (j, 0)),
    ]
    if has_mask:
        mask_p = jnp.zeros((sq_pad, sk_pad), jnp.int8)
        mask_p = mask_p.at[:Sq, :Sk].set(mask.astype(jnp.int8))
        operands.append(mask_p)
        in_specs.append(pl.BlockSpec((tq, tkv), lambda i, j: (i, j)))

    grid = (sq_pad // tq, sk_pad // tkv)

    kernel = functools.partial(
        _flash_kernel, has_mask=has_mask, kpad=kpad, sk_valid=Sk, tkv=tkv
    )

    out_p = pl.pallas_call(
        kernel,
        out_shape=jax.ShapeDtypeStruct((sq_pad, d_pad), jnp.float32),
        grid_spec=pltpu.PrefetchScalarGridSpec(
            num_scalar_prefetch=0,
            grid=grid,
            in_specs=in_specs,
            out_specs=pl.BlockSpec((tq, d_pad), lambda i, j: (i, 0)),
            scratch_shapes=[
                pltpu.VMEM((tq, 1), jnp.float32),    # running max
                pltpu.VMEM((tq, 1), jnp.float32),    # running sum
                pltpu.VMEM((tq, d_pad), jnp.float32) # accumulator
            ],
        ),
        compiler_params=pltpu.CompilerParams(
            dimension_semantics=("parallel", "arbitrary")
        ),
    )(*operands)

    return out_p[:Sq, :D]


# ---------------------------------------------------------------------------
# pure-JAX reference (matches the PyTorch module)
# ---------------------------------------------------------------------------
def _reference(enc_q, enc_k, enc_v, w_q, w_k, w_v, mask=None):
    q = enc_q @ w_q.T
    k = enc_k @ w_k.T
    v = enc_v @ w_v.T
    sim = q @ k.T / jnp.sqrt(jnp.float32(k.shape[1]))
    if mask is not None:
        sim = jnp.where(mask != 0, -1e9, sim)
    p = jax.nn.softmax(sim, axis=1)
    return p @ v


if __name__ == "__main__":
    key = jax.random.PRNGKey(0)
    S, D = 8, 32  # seq length, d_model

    k1, k2, k3, k4, k5, k6 = jax.random.split(key, 6)
    enc_q = jax.random.normal(k1, (S, D), dtype=jnp.float32)
    enc_k = jax.random.normal(k2, (S, D), dtype=jnp.float32)
    enc_v = jax.random.normal(k3, (S, D), dtype=jnp.float32)

    # nn.Linear-style weights (out_features, in_features)
    w_q = jax.random.normal(k4, (D, D), dtype=jnp.float32) * (1.0 / jnp.sqrt(D))
    w_k = jax.random.normal(k5, (D, D), dtype=jnp.float32) * (1.0 / jnp.sqrt(D))
    w_v = jax.random.normal(k6, (D, D), dtype=jnp.float32) * (1.0 / jnp.sqrt(D))

    # Causal mask: nonzero above the diagonal => masked out.
    causal_mask = (jnp.arange(S)[:, None] < jnp.arange(S)[None, :]).astype(jnp.int32)

    # f32 MXU operands: tight check (approx reciprocal => ~1e-3 level tolerance)
    out_m_f32 = attention(enc_q, enc_k, enc_v, w_q, w_k, w_v,
                          mask=causal_mask, use_bf16=False)
    out_u_f32 = attention(enc_q, enc_k, enc_v, w_q, w_k, w_v,
                          mask=None, use_bf16=False)
    # bf16 MXU operands (v6e/v7x fast path), f32 accumulation: looser check
    out_m_bf16 = attention(enc_q, enc_k, enc_v, w_q, w_k, w_v,
                           mask=causal_mask, use_bf16=True)
    out_u_bf16 = attention(enc_q, enc_k, enc_v, w_q, w_k, w_v,
                           mask=None, use_bf16=True)
    jax.block_until_ready((out_m_f32, out_u_f32, out_m_bf16, out_u_bf16))

    ref_m = _reference(enc_q, enc_k, enc_v, w_q, w_k, w_v, mask=causal_mask)
    ref_u = _reference(enc_q, enc_k, enc_v, w_q, w_k, w_v, mask=None)

    assert jnp.allclose(out_m_f32, ref_m, atol=5e-3, rtol=5e-3)
    assert jnp.allclose(out_u_f32, ref_u, atol=5e-3, rtol=5e-3)
    assert jnp.allclose(out_m_bf16, ref_m, atol=1e-1, rtol=1e-1)
    assert jnp.allclose(out_u_bf16, ref_u, atol=1e-1, rtol=1e-1)

    print("KERNEL_OK")
</pallas_src>

<mosaic_0001>
module attributes {stable_mosaic.version = 11 : i64} {
  func.func @_linear_kernel(%arg0: i32, %arg1: memref<8x128xf32, #tpu.memory_space<vmem>>, %arg2: memref<128x128xf32, #tpu.memory_space<vmem>>, %arg3: memref<8x128xf32, #tpu.memory_space<vmem>>) attributes {dimension_semantics = [#tpu.dimension_semantics<parallel>], iteration_bounds = array<i64: 1>, scalar_prefetch = 0 : i64, scratch_operands = 0 : i64, tpu.core_type = #tpu.core_type<tc>, window_params = [{transform_indices = @transform_0, window_bounds = array<i64: 8, 128>}, {pipeline_mode = #tpu.pipeline_mode<synchronous>, transform_indices = @transform_1, window_bounds = array<i64: 128, 128>}, {transform_indices = @transform_2, window_bounds = array<i64: 8, 128>}]} {
    %c0 = arith.constant 0 : index
    %c0_0 = arith.constant 0 : index
    %0 = vector.load %arg1[%c0, %c0_0] : memref<8x128xf32, #tpu.memory_space<vmem>>, vector<8x128xf32>
    %c0_1 = arith.constant 0 : index
    %c0_2 = arith.constant 0 : index
    %1 = vector.load %arg2[%c0_1, %c0_2] : memref<128x128xf32, #tpu.memory_space<vmem>>, vector<128x128xf32>
    %cst = arith.constant dense<0.000000e+00> : vector<8x128xf32>
    %2 = tpu.matmul %0, %1, %cst {dimension_numbers = #tpu.dot_dimension_numbers<[1], [1], [0], [0], [0, 0, 1, 0], [], []>} : vector<8x128xf32>, vector<128x128xf32>, vector<8x128xf32> -> vector<8x128xf32>
    %cst_3 = arith.constant 0.176776692 : f32
    %3 = vector.broadcast %cst_3 : f32 to vector<8x128xf32>
    %4 = arith.mulf %2, %3 : vector<8x128xf32>
    %c0_4 = arith.constant 0 : index
    %c0_5 = arith.constant 0 : index
    %5 = vector.load %arg3[%c0_4, %c0_5] : memref<8x128xf32, #tpu.memory_space<vmem>>, vector<8x128xf32>
    tpu.vector_store %arg3[%c0_4, %c0_5], %4 {strides = array<i32>} : memref<8x128xf32, #tpu.memory_space<vmem>>, vector<8x128xf32>,
    return
  }
  func.func @transform_0(%arg0: i32) -> (i32, i32) {
    %c0_i32 = arith.constant 0 : i32
    %c0_i32_0 = arith.constant 0 : i32
    return %arg0, %c0_i32 : i32, i32
  }
  func.func @transform_1(%arg0: i32) -> (i32, i32) {
    %c0_i32 = arith.constant 0 : i32
    %c0_i32_0 = arith.constant 0 : i32
    %c0_i32_1 = arith.constant 0 : i32
    return %c0_i32, %c0_i32_0 : i32, i32
  }
  func.func @transform_2(%arg0: i32) -> (i32, i32) {
    %c0_i32 = arith.constant 0 : i32
    %c0_i32_0 = arith.constant 0 : i32
    return %arg0, %c0_i32 : i32, i32
  }
}

</mosaic_0001>

<bundles_post_ra>
// kernel: tpu_custom_call.1
= control target key start
LH: loop header
LB: loop body
LE: loop exit
PB: predicated region body
PF: predicated region fallthrough
CT: control target
= control target key end

     0   :  { %7 = vsyncpa [#allocation3], 0  ;;  %s211_s0 = inlined_call_operand.hbm [shape: f32[8,128], index: 0, kind: input, shape index: {}]   ;;  %s212_s1 = inlined_call_operand.hbm [shape: f32[128,128], index: 1, kind: input, shape index: {}]   ;;  %s213_s2 = inlined_call_operand.hbm [shape: f32[8,128], index: 2, kind: output, shape index: {}]  }
   0x1   :  { %8 = vsyncpa [#allocation6], 0 }
   0x2   :  { %9 = vsyncpa [#allocation4], 0  ;;  %s15_s11 = sshll.u32 %s211_s0, 4  ;;  %s182_s12 = smov [#allocation2]   ;;  %s16_s11 = int_to_ptr.hbm [resolvable:$true] %s15_s11 }
   0x3   :  { %s17_s13 = sshll.u32 %s182_s12, 4  ;;  %s25_s16 = sshll.u32 %s212_s1, 4  ;;  %s18_s13 = int_to_ptr.vmem [resolvable:$true] %s17_s13  ;;  %s26_s16 = int_to_ptr.hbm [resolvable:$true] %s25_s16 }
   0x4   :  { %20 = dma.hbm_to_vmem [thread:$0]  %s16_s11, 128, %s18_s13, [#allocation3]  }
   0x5   :  { %s183_s17 = smov [#allocation5]   ;;  %s184_s19 = smov 128  }
   0x6   :  { %s27_s18 = sshll.u32 %s183_s17, 4  ;;  %s185_s20 = smov 8   ;;  %s28_s18 = int_to_ptr.vmem [resolvable:$true] %s27_s18 }
   0x7   :  { %33 = dma.hbm_to_vmem [thread:$0]  %s26_s16, 2048, %s28_s18, [#allocation6], %s184_s19, %s184_s19, %s185_s20  }
   0x8   :  { %176 = dma.done.wait [#allocation3], 128  }
   0x9   :  { %177 = vsyncadd [#allocation3], 4294967168 }
   0xa   :  { %178 = dma.done.wait [#allocation6], 2048  }
   0xb   :  { %179 = vsyncadd [#allocation6], 4294965248  ;;  %v58_v0 = vld [vmem:[#allocation5 + $0x78] sm:$0xff]  ;;  %v57_v1 = vld [vmem:[#allocation5 + $0x70] sm:$0xff]  ;;  %s186_s0 = smov [#allocation7]   ;;  %s88_s23 = sshll.u32 %s213_s2, 4  ;;  %s89_s23 = int_to_ptr.hbm [resolvable:$true] %s88_s23 }
   0xc   :  { %59 = vmatpush.xpose.msra.mxu0 %v58_v0  ;;  %v56_v2 = vld [vmem:[#allocation5 + $0x68] sm:$0xff]  ;;  %v55_v3 = vld [vmem:[#allocation5 + $0x60] sm:$0xff]  ;;  %v54_v4 = vld [vmem:[#allocation5 + $0x58] sm:$0xff]  ;;  %s86_s1 = sshll.u32 %s186_s0, 4  ;;  %s87_s1 = int_to_ptr.vmem [resolvable:$true] %s86_s1 }
   0xd   :  { %v53_v5 = vld [vmem:[#allocation5 + $0x50] sm:$0xff]  ;;  %v52_v6 = vld [vmem:[#allocation5 + $0x48] sm:$0xff]  ;;  %v51_v7 = vld [vmem:[#allocation5 + $0x40] sm:$0xff] }
   0xe   :  { %v50_v8 = vld [vmem:[#allocation5 + $0x38] sm:$0xff]  ;;  %v49_v9 = vld [vmem:[#allocation5 + $0x30] sm:$0xff]  ;;  %v48_v10 = vld [vmem:[#allocation5 + $0x28] sm:$0xff] }
   0xf   :  { %v47_v11 = vld [vmem:[#allocation5 + $0x20] sm:$0xff]  ;;  %v46_v12 = vld [vmem:[#allocation5 + $0x18] sm:$0xff]  ;;  %v45_v13 = vld [vmem:[#allocation5 + $0x10] sm:$0xff] }
  0x10   :  { %60 = vmatpush.xpose.msra.mxu0 %v57_v1  ;;  %v44_v14 = vld [vmem:[#allocation5 + $0x8] sm:$0xff]  ;;  %v43_v15 = vld [vmem:[#allocation5] sm:$0xff]  ;;  %v42_v16 = vld [vmem:[#allocation2] sm:$0xff] }
  0x14   :  { %61 = vmatpush.xpose.msra.mxu0 %v56_v2 }
  0x18   :  { %62 = vmatpush.xpose.msra.mxu0 %v55_v3 }
  0x1c   :  { %63 = vmatpush.xpose.msra.mxu0 %v54_v4 }
  0x20   :  { %64 = vmatpush.xpose.msra.mxu0 %v53_v5 }
  0x24   :  { %65 = vmatpush.xpose.msra.mxu0 %v52_v6 }
  0x28   :  { %66 = vmatpush.xpose.msra.mxu0 %v51_v7 }
  0x2c   :  { %67 = vmatpush.xpose.msra.mxu0 %v50_v8 }
  0x30   :  { %68 = vmatpush.xpose.msra.mxu0 %v49_v9 }
  0x34   :  { %69 = vmatpush.xpose.msra.mxu0 %v48_v10 }
  0x38   :  { %70 = vmatpush.xpose.msra.mxu0 %v47_v11 }
  0x3c   :  { %71 = vmatpush.xpose.msra.mxu0 %v46_v12 }
  0x40   :  { %72 = vmatpush.xpose.msra.mxu0 %v45_v13 }
  0x44   :  { %73 = vmatpush.xpose.msra.mxu0 %v44_v14 }
  0x48   :  { %74 = vmatpush.xpose.msra.mxu0 %v43_v15 }
  0x4b   :  { %75 = vmatmul.f32.vlgmr.msra.gmra.mxu0 %v42_v16 }
  0xc8   :  { %v76_v17 = vpop.f32.mrf.mxu0 }
  0xc9   :  { %v79_v18 = vmul.f32 0.17677669, %v76_v17 }
  0xcb   :  { %80 = vst [vmem:[#allocation7] sm:$0xff] %v79_v18 }
  0xcc   :  { %91 = dma.vmem_to_hbm [thread:$0]  %s87_s1, 128, %s89_s23, [#allocation4]  }
  0xcd   :  { %180 = dma.done.wait [#allocation4], 128  }
  0xce   :  { %181 = vsyncadd [#allocation4], 4294967168 }
  0xcf   :  { %96 = vsyncpa [#allocation3], 1 }
  0xd0   :  { %97 = vsyncpa [#allocation6], 1 }
  0xd1   :  { %98 = vsyncpa [#allocation4], 1 }

</bundles_post_ra>
